<compile_context>
chip_gen: v5e
topology: v5e:2x2
jax: 0.10.0
libtpu: 0.0.40
codegen_flags: <defaults>
</compile_context>

<pallas_src>
import jax
import jax.numpy as jnp
from jax.experimental import pallas as pl
from jax.experimental.pallas import tpu as pltpu

# ---------------- X3DStem config (mirrors the PyTorch constructor args) -----
DIM_IN = 3             # dim_in (rgb)
DIM_OUT = 24           # dim_out
KT, KH, KW = 5, 3, 3   # kernel  (t, h, w)
ST, SH, SW = 1, 2, 2   # stride  (t, h, w)
PT, PH, PW = 2, 1, 1   # padding (t, h, w)
BN_EPS = 1e-5
assert ST == 1, "fused kernel assumes temporal stride 1 (X3D stem default)"

# Small example shapes (batch=2, rgb channels=3, T=8, spatial=16)
N, T, H, W = 2, 8, 16, 16
HO = (H + 2 * PH - KH) // SH + 1           # 8
WO = (W + 2 * PW - KW) // SW + 1           # 8
TOUT = (T + 2 * PT - KT) // ST + 1         # 8
TP = T + 2 * PT                            # 12  (temporally padded length)
HW = HO * WO                               # 64
THW = T * HW                               # 512 (lane dim of spatial-conv output)
TOHW = TOUT * HW                           # 512 (lane dim of final output)
K2 = KH * KW * DIM_IN                      # 27  (matmul contraction dim)
K2P = 32                                   # K2 zero-padded to a sublane multiple


# ---------------------------------------------------------------- fused kernel
def _x3d_stem_fused_kernel(p_ref, w2_ref, wt_ref, shift_ref, o_ref, y1p_ref):
    """Spatial conv (one K=32 bf16 matmul) + depthwise temporal conv + BN + ReLU.

    p_ref     : (K2P, THW)      im2col patches of one batch element, bf16
    w2_ref    : (DIM_OUT, K2P)  spatial conv weight (taps on contraction axis), bf16
    wt_ref    : (DIM_OUT, KT)   depthwise temporal filters with BN scale folded, f32
    shift_ref : (DIM_OUT, 1)    folded BN shift, f32
    o_ref     : (DIM_OUT, TOHW) output, channels on sublanes, (t,ho,wo) on lanes
    y1p_ref   : (DIM_OUT, TP*HW) f32 VMEM scratch: spatial-conv output + zero halos
    """
    # --- spatial 1xKHxKW conv: single MXU matmul, bf16 in / f32 accumulate ----
    y1 = jnp.dot(w2_ref[...], p_ref[...],
                 preferred_element_type=jnp.float32)          # (DIM_OUT, THW)

    # --- scratch-backed temporal zero halo (halo width PT*HW = 128 lanes) -----
    y1p_ref[:, :PT * HW] = jnp.zeros((DIM_OUT, PT * HW), jnp.float32)
    y1p_ref[:, PT * HW + THW:] = jnp.zeros((DIM_OUT, PT * HW), jnp.float32)
    y1p_ref[:, PT * HW:PT * HW + THW] = y1

    # --- KTx1x1 depthwise temporal conv: KT lane-dense VPU FMAs (ST == 1) -----
    wt = wt_ref[...]                                          # (DIM_OUT, KT)
    acc = jnp.zeros((DIM_OUT, TOHW), jnp.float32)
    for dt in range(KT):                                      # unrolled, static slices
        acc = acc + y1p_ref[:, dt * HW: dt * HW + TOHW] * wt[:, dt:dt + 1]

    # --- folded BatchNorm shift (scale already in wt) + ReLU epilogue ---------
    o_ref[...] = jnp.maximum(acc + shift_ref[...], 0.0).astype(o_ref.dtype)


# ---------------------------------------------------------------- wrapper
def x3d_stem_forward(x_ncthw, w_xy, w_t, gamma, beta, running_mean, running_var):
    """x_ncthw: (N, Cin, T, H, W). Weights in PyTorch layouts:
       w_xy: (Cout, Cin, 1, KH, KW), w_t: (Cout, 1, KT, 1, 1), BN params: (Cout,)."""
    x = x_ncthw.astype(jnp.float32)

    # Cheap XLA prep on the small raw input: spatial pad + im2col of the 3x3 taps.
    xp = jnp.pad(x, ((0, 0), (0, 0), (0, 0), (PH, PH), (PW, PW)))
    taps = []
    for dh in range(KH):
        for dw in range(KW):
            taps.append(jax.lax.slice(
                xp, (0, 0, 0, dh, dw),
                (N, DIM_IN, T, dh + (HO - 1) * SH + 1, dw + (WO - 1) * SW + 1),
                (1, 1, 1, SH, SW)))                       # (N, Cin, T, HO, WO)
    patches = jnp.stack(taps, axis=1)                     # (N, KH*KW, Cin, T, HO, WO)
    p = patches.reshape(N, K2, THW)   # k=(dh*KW+dw)*Cin+cin, l=(t*HO+ho)*WO+wo
    # Zero-pad contraction dim to a sublane-aligned 32 and cast to bf16 (DMA payload).
    p = jnp.pad(p, ((0, 0), (0, K2P - K2), (0, 0))).astype(jnp.bfloat16)

    # Weight rearrangement + inference-mode BN fold (tiny, once, in XLA).
    w2 = jnp.transpose(w_xy[:, :, 0, :, :], (0, 2, 3, 1)).reshape(DIM_OUT, K2)
    w2 = jnp.pad(w2, ((0, 0), (0, K2P - K2))).astype(jnp.bfloat16)
    scale = gamma / jnp.sqrt(running_var + BN_EPS)            # (DIM_OUT,), f32
    shift = (beta - running_mean * scale).astype(jnp.float32)
    # Fold BN scale into the per-channel temporal weights (exact; stays f32).
    wt = (w_t[:, 0, :, 0, 0] * scale[:, None]).astype(jnp.float32)   # (DIM_OUT, KT)

    out_flat = pl.pallas_call(
        _x3d_stem_fused_kernel,
        out_shape=jax.ShapeDtypeStruct((N, DIM_OUT, TOHW), jnp.float32),
        grid=(N,),
        in_specs=[
            pl.BlockSpec((None, K2P, THW), lambda n: (n, 0, 0)),
            pl.BlockSpec((DIM_OUT, K2P), lambda n: (0, 0)),
            pl.BlockSpec((DIM_OUT, KT), lambda n: (0, 0)),
            pl.BlockSpec((DIM_OUT, 1), lambda n: (0, 0)),
        ],
        out_specs=pl.BlockSpec((None, DIM_OUT, TOHW), lambda n: (n, 0, 0)),
        scratch_shapes=[pltpu.VMEM((DIM_OUT, TP * HW), jnp.float32)],
        compiler_params=pltpu.CompilerParams(
            dimension_semantics=("parallel",)),
    )(p, w2, wt, shift.reshape(DIM_OUT, 1))

    # (N, C, T*HO*WO) -> NCTHW: contiguous reshape only, no transpose.
    return out_flat.reshape(N, DIM_OUT, TOUT, HO, WO)


# ------------------------------------------------------------ pure-JAX reference
def _reference(x, w_xy, w_t, gamma, beta, running_mean, running_var):
    x = x.astype(jnp.float32)
    xp = jnp.pad(x, ((0, 0), (0, 0), (0, 0), (PH, PH), (PW, PW)))
    y1 = jnp.zeros((N, DIM_OUT, T, HO, WO), jnp.float32)
    for dh in range(KH):
        for dw in range(KW):
            patch = xp[:, :, :, dh:dh + (HO - 1) * SH + 1:SH,
                              dw:dw + (WO - 1) * SW + 1:SW]     # (N,Cin,T,HO,WO)
            y1 = y1 + jnp.einsum("ncthw,oc->nothw", patch, w_xy[:, :, 0, dh, dw])
    y1p = jnp.pad(y1, ((0, 0), (0, 0), (PT, PT), (0, 0), (0, 0)))
    y2 = jnp.zeros((N, DIM_OUT, TOUT, HO, WO), jnp.float32)
    for dt in range(KT):
        wdt = w_t[:, 0, dt, 0, 0][None, :, None, None, None]
        y2 = y2 + y1p[:, :, dt:dt + (TOUT - 1) * ST + 1:ST] * wdt
    scale = gamma / jnp.sqrt(running_var + BN_EPS)
    shift = beta - running_mean * scale
    y2 = y2 * scale[None, :, None, None, None] + shift[None, :, None, None, None]
    return jnp.maximum(y2, 0.0)


if __name__ == "__main__":
    key = jax.random.PRNGKey(0)
    kx, kw1, kw2, kg, kb, km, kv = jax.random.split(key, 7)

    # Input in PyTorch NCTHW convention.
    x = jax.random.normal(kx, (N, DIM_IN, T, H, W), jnp.float32)

    # Weights / BN params in PyTorch layouts.
    w_xy = 0.1 * jax.random.normal(kw1, (DIM_OUT, DIM_IN, 1, KH, KW), jnp.float32)
    w_t = 0.1 * jax.random.normal(kw2, (DIM_OUT, 1, KT, 1, 1), jnp.float32)
    gamma = 1.0 + 0.05 * jax.random.normal(kg, (DIM_OUT,), jnp.float32)
    beta = 0.05 * jax.random.normal(kb, (DIM_OUT,), jnp.float32)
    running_mean = 0.05 * jax.random.normal(km, (DIM_OUT,), jnp.float32)
    running_var = 1.0 + 0.05 * jax.random.uniform(kv, (DIM_OUT,), jnp.float32)

    fwd = jax.jit(x3d_stem_forward)
    out = fwd(x, w_xy, w_t, gamma, beta, running_mean, running_var)
    out = jax.block_until_ready(out)

    ref = _reference(x, w_xy, w_t, gamma, beta, running_mean, running_var)
    assert out.shape == (N, DIM_OUT, TOUT, HO, WO), out.shape
    err = float(jnp.max(jnp.abs(out - ref)))
    # Tolerance relaxed vs. the all-f32 version: patches/spatial weight are bf16
    # (f32 accumulation), so ~0.3-1% relative noise is expected.
    assert jnp.allclose(out, ref, atol=2e-2, rtol=2e-2), f"max abs err {err}"
    print("KERNEL_OK")
</pallas_src>

<mosaic_0001>
module attributes {stable_mosaic.version = 11 : i64} {
  func.func @_x3d_stem_fused_kernel(%arg0: i32, %arg1: memref<1x32x512xbf16, #tpu.memory_space<vmem>>, %arg2: memref<24x32xbf16, #tpu.memory_space<vmem>>, %arg3: memref<24x5xf32, #tpu.memory_space<vmem>>, %arg4: memref<24x1xf32, #tpu.memory_space<vmem>>, %arg5: memref<1x24x512xf32, #tpu.memory_space<vmem>>, %arg6: memref<24x768xf32, #tpu.memory_space<vmem>>) attributes {dimension_semantics = [#tpu.dimension_semantics<parallel>], iteration_bounds = array<i64: 2>, scalar_prefetch = 0 : i64, scratch_operands = 1 : i64, tpu.core_type = #tpu.core_type<tc>, window_params = [{transform_indices = @transform_0, window_bounds = array<i64: 1, 32, 512>}, {pipeline_mode = #tpu.pipeline_mode<synchronous>, transform_indices = @transform_1, window_bounds = array<i64: 24, 32>}, {pipeline_mode = #tpu.pipeline_mode<synchronous>, transform_indices = @transform_2, window_bounds = array<i64: 24, 5>}, {pipeline_mode = #tpu.pipeline_mode<synchronous>, transform_indices = @transform_3, window_bounds = array<i64: 24, 1>}, {transform_indices = @transform_4, window_bounds = array<i64: 1, 24, 512>}]} {
    %c0 = arith.constant 0 : index
    %c0_0 = arith.constant 0 : index
    %0 = vector.load %arg2[%c0, %c0_0] : memref<24x32xbf16, #tpu.memory_space<vmem>>, vector<24x32xbf16>
    %c0_1 = arith.constant 0 : index
    %c0_2 = arith.constant 0 : index
    %c0_3 = arith.constant 0 : index
    %1 = vector.load %arg1[%c0_1, %c0_2, %c0_3] : memref<1x32x512xbf16, #tpu.memory_space<vmem>>, vector<1x32x512xbf16>
    %2 = vector.shape_cast %1 : vector<1x32x512xbf16> to vector<32x512xbf16>
    %cst = arith.constant dense<0.000000e+00> : vector<24x512xf32>
    %3 = tpu.matmul %0, %2, %cst {dimension_numbers = #tpu.dot_dimension_numbers<[1], [0], [0], [1], [0, 0, 1, 1], [], []>} : vector<24x32xbf16>, vector<32x512xbf16>, vector<24x512xf32> -> vector<24x512xf32>
    %cst_4 = arith.constant 0.000000e+00 : f32
    %4 = vector.broadcast %cst_4 : f32 to vector<24x128xf32>
    %c0_5 = arith.constant 0 : index
    %c0_6 = arith.constant 0 : index
    %5 = vector.load %arg6[%c0_5, %c0_6] : memref<24x768xf32, #tpu.memory_space<vmem>>, vector<24x128xf32>
    tpu.vector_store %arg6[%c0_5, %c0_6], %4 {strides = array<i32>} : memref<24x768xf32, #tpu.memory_space<vmem>>, vector<24x128xf32>,
    %cst_7 = arith.constant 0.000000e+00 : f32
    %6 = vector.broadcast %cst_7 : f32 to vector<24x128xf32>
    %c0_8 = arith.constant 0 : index
    %c640 = arith.constant 640 : index
    %7 = vector.load %arg6[%c0_8, %c640] : memref<24x768xf32, #tpu.memory_space<vmem>>, vector<24x128xf32>
    tpu.vector_store %arg6[%c0_8, %c640], %6 {strides = array<i32>} : memref<24x768xf32, #tpu.memory_space<vmem>>, vector<24x128xf32>,
    %c0_9 = arith.constant 0 : index
    %c128 = arith.constant 128 : index
    %8 = vector.load %arg6[%c0_9, %c128] : memref<24x768xf32, #tpu.memory_space<vmem>>, vector<24x512xf32>
    tpu.vector_store %arg6[%c0_9, %c128], %3 {strides = array<i32>} : memref<24x768xf32, #tpu.memory_space<vmem>>, vector<24x512xf32>,
    %c0_10 = arith.constant 0 : index
    %c0_11 = arith.constant 0 : index
    %9 = vector.load %arg3[%c0_10, %c0_11] : memref<24x5xf32, #tpu.memory_space<vmem>>, vector<24x5xf32>
    %cst_12 = arith.constant 0.000000e+00 : f32
    %10 = vector.broadcast %cst_12 : f32 to vector<24x512xf32>
    %c0_13 = arith.constant 0 : index
    %c0_14 = arith.constant 0 : index
    %11 = vector.load %arg6[%c0_13, %c0_14] : memref<24x768xf32, #tpu.memory_space<vmem>>, vector<24x512xf32>
    %12 = vector.extract_strided_slice %9 {offsets = [0, 0], sizes = [24, 1], strides = [1, 1]} : vector<24x5xf32> to vector<24x1xf32>
    %13 = vector.broadcast %12 : vector<24x1xf32> to vector<24x512xf32>
    %14 = arith.mulf %11, %13 : vector<24x512xf32>
    %15 = arith.addf %10, %14 : vector<24x512xf32>
    %c0_15 = arith.constant 0 : index
    %c64 = arith.constant 64 : index
    %16 = vector.load %arg6[%c0_15, %c64] : memref<24x768xf32, #tpu.memory_space<vmem>>, vector<24x512xf32>
    %17 = vector.extract_strided_slice %9 {offsets = [0, 1], sizes = [24, 1], strides = [1, 1]} : vector<24x5xf32> to vector<24x1xf32>
    %18 = vector.broadcast %17 : vector<24x1xf32> to vector<24x512xf32>
    %19 = arith.mulf %16, %18 : vector<24x512xf32>
    %20 = arith.addf %15, %19 : vector<24x512xf32>
    %c0_16 = arith.constant 0 : index
    %c128_17 = arith.constant 128 : index
    %21 = vector.load %arg6[%c0_16, %c128_17] : memref<24x768xf32, #tpu.memory_space<vmem>>, vector<24x512xf32>
    %22 = vector.extract_strided_slice %9 {offsets = [0, 2], sizes = [24, 1], strides = [1, 1]} : vector<24x5xf32> to vector<24x1xf32>
    %23 = vector.broadcast %22 : vector<24x1xf32> to vector<24x512xf32>
    %24 = arith.mulf %21, %23 : vector<24x512xf32>
    %25 = arith.addf %20, %24 : vector<24x512xf32>
    %c0_18 = arith.constant 0 : index
    %c192 = arith.constant 192 : index
    %26 = vector.load %arg6[%c0_18, %c192] : memref<24x768xf32, #tpu.memory_space<vmem>>, vector<24x512xf32>
    %27 = vector.extract_strided_slice %9 {offsets = [0, 3], sizes = [24, 1], strides = [1, 1]} : vector<24x5xf32> to vector<24x1xf32>
    %28 = vector.broadcast %27 : vector<24x1xf32> to vector<24x512xf32>
    %29 = arith.mulf %26, %28 : vector<24x512xf32>
    %30 = arith.addf %25, %29 : vector<24x512xf32>
    %c0_19 = arith.constant 0 : index
    %c256 = arith.constant 256 : index
    %31 = vector.load %arg6[%c0_19, %c256] : memref<24x768xf32, #tpu.memory_space<vmem>>, vector<24x512xf32>
    %32 = vector.extract_strided_slice %9 {offsets = [0, 4], sizes = [24, 1], strides = [1, 1]} : vector<24x5xf32> to vector<24x1xf32>
    %33 = vector.broadcast %32 : vector<24x1xf32> to vector<24x512xf32>
    %34 = arith.mulf %31, %33 : vector<24x512xf32>
    %35 = arith.addf %30, %34 : vector<24x512xf32>
    %c0_20 = arith.constant 0 : index
    %c0_21 = arith.constant 0 : index
    %36 = vector.load %arg4[%c0_20, %c0_21] : memref<24x1xf32, #tpu.memory_space<vmem>>, vector<24x1xf32>
    %37 = vector.broadcast %36 : vector<24x1xf32> to vector<24x512xf32>
    %38 = arith.addf %35, %37 : vector<24x512xf32>
    %cst_22 = arith.constant 0.000000e+00 : f32
    %39 = vector.broadcast %cst_22 : f32 to vector<24x512xf32>
    %40 = arith.maximumf %38, %39 : vector<24x512xf32>
    %c0_23 = arith.constant 0 : index
    %c0_24 = arith.constant 0 : index
    %c0_25 = arith.constant 0 : index
    %41 = vector.load %arg5[%c0_23, %c0_24, %c0_25] : memref<1x24x512xf32, #tpu.memory_space<vmem>>, vector<1x24x512xf32>
    %42 = vector.shape_cast %41 : vector<1x24x512xf32> to vector<24x512xf32>
    %43 = vector.shape_cast %40 : vector<24x512xf32> to vector<1x24x512xf32>
    tpu.vector_store %arg5[%c0_23, %c0_24, %c0_25], %43 {strides = array<i32>} : memref<1x24x512xf32, #tpu.memory_space<vmem>>, vector<1x24x512xf32>,
    return
  }
  func.func @transform_0(%arg0: i32) -> (i32, i32, i32) {
    %c0_i32 = arith.constant 0 : i32
    %c0_i32_0 = arith.constant 0 : i32
    %c0_i32_1 = arith.constant 0 : i32
    return %arg0, %c0_i32, %c0_i32_0 : i32, i32, i32
  }
  func.func @transform_1(%arg0: i32) -> (i32, i32) {
    %c0_i32 = arith.constant 0 : i32
    %c0_i32_0 = arith.constant 0 : i32
    %c0_i32_1 = arith.constant 0 : i32
    return %c0_i32, %c0_i32_0 : i32, i32
  }
  func.func @transform_2(%arg0: i32) -> (i32, i32) {
    %c0_i32 = arith.constant 0 : i32
    %c0_i32_0 = arith.constant 0 : i32
    %c0_i32_1 = arith.constant 0 : i32
    return %c0_i32, %c0_i32_0 : i32, i32
  }
  func.func @transform_3(%arg0: i32) -> (i32, i32) {
    %c0_i32 = arith.constant 0 : i32
    %c0_i32_0 = arith.constant 0 : i32
    %c0_i32_1 = arith.constant 0 : i32
    return %c0_i32, %c0_i32_0 : i32, i32
  }
  func.func @transform_4(%arg0: i32) -> (i32, i32, i32) {
    %c0_i32 = arith.constant 0 : i32
    %c0_i32_0 = arith.constant 0 : i32
    %c0_i32_1 = arith.constant 0 : i32
    return %arg0, %c0_i32, %c0_i32_0 : i32, i32, i32
  }
}

</mosaic_0001>

<bundles_post_ra>
// kernel: x3d_stem_forward.1
= control target key start
LH: loop header
LB: loop body
LE: loop exit
PB: predicated region body
PF: predicated region fallthrough
CT: control target
= control target key end

     0   :  { %s971_s15 = smov 0   ;;  %s1295_s0 = inlined_call_operand.vmem [shape: bf16[2,32,512], index: 0, kind: input, shape index: {}]   ;;  %s1296_s1 = inlined_call_operand.vmem [shape: bf16[24,32], index: 1, kind: input, shape index: {}]   ;;  %s1297_s2 = inlined_call_operand.vmem [shape: f32[24,5], index: 2, kind: input, shape index: {}]   ;;  %s1298_s3 = inlined_call_operand.vmem [shape: f32[24,1], index: 3, kind: input, shape index: {}]   ;;  %s1299_s4 = inlined_call_operand.vmem [shape: f32[2,24,512], index: 4, kind: output, shape index: {}]  }
   0x1 LB: > { %s837_s16 = sadd.s32 4294967295, %s938_s15   ;;  %p841_p0 = scmp.ge.s32.totalorder %s938_s15, 1  ;;  %s938_s15 = sphi %s971_s15, %s14_s15  }
   0x2   : > { %p162_p1 = scmp.lt.s32.totalorder %s938_s15, 3 }
   0x4   : > { %p163_p2 = pnand %p841_p0, %p162_p1 }
   0x5   : > { %p188_p3 = scmp.lt.s32.totalorder (!%p163_p2), %s837_s16, 1  ;;  %s945_s5 = smov (!%p163_p2), 64  }
   0x6   : > { %166 = sbr.rel (%p163_p2) target bundleno = 368 (0x170), region = 36 }
   0xb   : > { %v982_v0 = vld [vmem:[%s1297_s2 + $0x10] sm:$0xff]  ;;  %v987_v1 = vld [vmem:[%s1297_s2] sm:$0xff]  ;;  %v940_v2 = vmov 0   ;;  %s1301_s16 = smov (!%p188_p3, %s837_s16), 1  ;;  %v998_v3 = vld [vmem:[%s1297_s2 + $0x8] sm:$0xff]  ;;  %v941_v4 = vmov 1  }
   0xc   : > { %917 = vset.pattern.permute.xlu1 %v940_v2  ;;  %916 = vset.pattern.permute.xlu0 %v940_v2  ;;  %s891_s23 = sshll.u32 %s1301_s16, 6  ;;  %v892_v29 = vld [vmem:[%s1296_s1] sm:$0xff]  ;;  %vm258_vm0 = vcmask 261120   ;;  %v942_v30 = vmov 2   ;;  %v201_v31 = vld [vmem:[%s1296_s1 + $0x8] sm:$0xf] }
   0xd   : > { %382 = vperm.xlu1 %917, %v982_v0   ;;  %372 = vperm.xlu0 %916, %v987_v1   ;;  %s192_s26 = scalar_lea.vmem %s1295_s0, %s891_s23  ;;  %v215_v32 = vunpack.c.l.b16 %v201_v31  ;;  %v943_v34 = vmov 3   ;;  %v944_v35 = vmov 4   ;;  %vm496_vm1 = vcmask 523264   ;;  %s901_s12 = smul.u32 96, %s1301_s16 }
   0xe   : > { %919 = vset.pattern.permute.xlu2 %v941_v4  ;;  %v867_v5 = vld [vmem:[%s192_s26 + $0x20] sm:$0xf]  ;;  %v899_v6 = vld [vmem:[%s192_s26 + $0x2c] sm:$0xf0]  ;;  %v897_v7 = vld [vmem:[%s192_s26 + $0x24] sm:$0xf] }
   0xf   : > { %429 = vperm.xlu2 %919, %v998_v3   ;;  %v868_v8 = vor.u32 %v899_v6, %v867_v5  ;;  %v869_v9 = vld [vmem:[%s192_s26 + $0x30] sm:$0xf0]  ;;  %v875_v10 = vld [vmem:[%s192_s26 + $0x28] sm:$0xf]  ;;  %v900_v11 = vld [vmem:[%s192_s26 + $0x34] sm:$0xf0]  ;;  %v217_v33 = vpack.c.b16 %v215_v32, %v215_v32  ;;  %s1229_s17 = scalar_lea.vmem %s1299_s4, %s901_s12 }
  0x10   : > { %v872_v12 = vor.u32 %v897_v7, %v869_v9  ;;  %v876_v13 = vor.u32 %v900_v11, %v875_v10  ;;  %v898_v14 = vld [vmem:[%s192_s26 + $0x2c] sm:$0xf]  ;;  %v877_v15 = vld [vmem:[%s192_s26 + $0x38] sm:$0xf0]  ;;  %v851_v16 = vld [vmem:[%s192_s26] sm:$0xf] }
  0x11   : > { %271 = vmatpush.bf16.msra.mxu0 %v868_v8  ;;  %v880_v17 = vor.u32 %v898_v14, %v877_v15  ;;  %v895_v18 = vld [vmem:[%s192_s26 + $0xc] sm:$0xf0]  ;;  %v893_v19 = vld [vmem:[%s192_s26 + $0x4] sm:$0xf]  ;;  %v853_v20 = vld [vmem:[%s192_s26 + $0x10] sm:$0xf0] }
  0x12   : > { %289 = vmatpush.bf16.msra.mxu1 %v872_v12  ;;  %307 = vmatpush.bf16.msra.mxu2 %v876_v13  ;;  %v852_v21 = vor.u32 %v895_v18, %v851_v16  ;;  %v856_v22 = vor.u32 %v893_v19, %v853_v20  ;;  %v859_v23 = vld [vmem:[%s192_s26 + $0x8] sm:$0xf]  ;;  %v896_v24 = vld [vmem:[%s192_s26 + $0x14] sm:$0xf0]  ;;  %v894_v25 = vld [vmem:[%s192_s26 + $0xc] sm:$0xf] }
  0x13   : > { %325 = vmatpush.bf16.msra.mxu3 %v880_v17  ;;  %v860_v26 = vor.u32 %v896_v24, %v859_v23  ;;  %v861_v27 = vld [vmem:[%s192_s26 + $0x18] sm:$0xf0] }
  0x14   : > { %v864_v28 = vor.u32 %v894_v25, %v861_v27 }
  0x15   : > { %918 = vset.pattern.permute.xlu1 %v941_v4  ;;  %377 = vperm.xlu0 %916, %v998_v3  }
  0x16   : > { %425 = vperm.xlu1 %918, %v987_v1   ;;  %272 = vmatpush.bf16.msra.mxu0 %v852_v21 }
  0x17   : > { %433 = vperm.xlu2 %919, %v982_v0   ;;  %290 = vmatpush.bf16.msra.mxu1 %v856_v22 }
  0x18   : > { %308 = vmatpush.bf16.msra.mxu2 %v860_v26  ;;  %326 = vmatpush.bf16.msra.mxu3 %v864_v28 }
  0x19   : > { %881 = vmatmul.msk.bf16.vlgmr.msra.gmra.mxu0 %vm258_vm0, %v892_v29 }
  0x1a   : > { %883 = vmatmul.msk.bf16.vlgmr.msra.gmra.mxu1 %vm258_vm0, %v892_v29 }
  0x1b   : > { %885 = vmatmul.msk.bf16.vlgmr.msra.gmra.mxu2 %vm258_vm0, %v892_v29  ;;  %887 = vmatmul.msk.bf16.vlgmr.msra.gmra.mxu3 %vm258_vm0, %v892_v29 }
  0x1d   : > { %920 = vset.pattern.permute.xlu0 %v942_v30 }
  0x1e   : > { %921 = vset.pattern.permute.xlu1 %v942_v30  ;;  %534 = vperm.xlu0 %920, %v987_v1  }
  0x1f   : > { %538 = vperm.xlu1 %921, %v998_v3   ;;  %922 = vset.pattern.permute.xlu2 %v942_v30 }
  0x20   : > { %542 = vperm.xlu2 %922, %v982_v0  }
  0x26   : > { %925 = vset.pattern.permute.xlu0 %v943_v34 }
  0x27   : > { %923 = vset.pattern.permute.xlu1 %v943_v34  ;;  %593 = vperm.xlu0 %925, %v982_v0  }
  0x28   : > { %585 = vperm.xlu1 %923, %v987_v1   ;;  %924 = vset.pattern.permute.xlu2 %v943_v34 }
  0x29   : > { %882 = vmatmul.msk.bf16.gmra.mxu0 %vm258_vm0, %v217_v33  ;;  %589 = vperm.xlu2 %924, %v998_v3  }
  0x2a   : > { %884 = vmatmul.msk.bf16.gmra.mxu1 %vm258_vm0, %v217_v33 }
  0x2b   : > { %886 = vmatmul.msk.bf16.gmra.mxu2 %vm258_vm0, %v217_v33  ;;  %888 = vmatmul.msk.bf16.gmra.mxu3 %vm258_vm0, %v217_v33 }
  0x2f   : > { %927 = vset.pattern.permute.xlu0 %v944_v35 }
  0x30   : > { %928 = vset.pattern.permute.xlu1 %v944_v35 }
  0x31   : > { %926 = vset.pattern.permute.xlu2 %v944_v35 }
  0x32   : > { %693 = vperm.xlu2 %926, %v987_v1  }
  0x3a   : > { %929 = vset.pattern.permute.xlu2 %v940_v2 }
  0x69   : > { %v1030_v36 = vpop.permute.xlu2 %429 }
  0x6a   : > { %v441_v37 = vmul.f32 0.0, %v1030_v36 }
  0x6c   : > { %476 = vrot.lane.b32.xlu2 %v441_v37, %s945_s5 }
  0x71   : > { %v1034_v38 = vpop.permute.xlu2 %433 }
  0x72   : > { %v446_v39 = vmul.f32 0.0, %v1034_v38 }
  0x74   : > { %486 = vrot.lane.b32.xlu1 %v446_v39, %s945_s5 }
  0x7a   : > { %v1038_v40 = vpop.permute.xlu2 %542 }
  0x7f   : > { %v1040_v41 = vpop.permute.xlu0 %372  ;;  %v1042_v42 = vpop.permute.xlu1 %382 }
  0x83   : > { %v1044_v43 = vpop.permute.xlu2 %589 }
  0x84   : > { %v605_v44 = vmul.f32 0.0, %v1044_v43 }
  0x86   : > { %644 = vrot.lane.b32.xlu2 %v605_v44, %s945_s5 }
  0x87   : > { %v1048_v45 = vpop.permute.xlu0 %377 }
  0x88   : > { %v426_v46 = vpop.permute.xlu1 %425 }
  0x89   : > { %v436_v47 = vmul.f32 0.0, %v426_v46 }
  0x8b   : > { %466 = vrot.lane.b32.xlu0 %v436_v47, %s945_s5 }
  0x8c   : > { %v1055_v53 = vpop.permute.xlu2 %693 }
  0x90   : > { %v535_v48 = vpop.permute.xlu0 %534 }
  0x91   : > { %v1051_v49 = vpop.permute.xlu1 %538 }
  0x96   : > { %v274_v50 = vpop.f32.mrf.mxu0 }
  0x97   : > { %v1053_v51 = vmul.f32 %v535_v48, %v274_v50  ;;  %v292_v52 = vpop.f32.mrf.mxu1  ;;  %v1058_v54 = vmul.f32 %v1040_v41, %v274_v50  ;;  %v437_v14 = vmul.f32 %v426_v46, %v274_v50 }
  0x98   : > { %v438_v55 = vmul.f32 %v426_v46, %v292_v52  ;;  %v1061_v56 = vmul.f32 %v1055_v53, %v292_v52  ;;  %v1064_v57 = vmul.f32 %v1040_v41, %v292_v52  ;;  %v1066_v58 = vmul.f32 %v535_v48, %v292_v52 }
  0x99   : > { %v1068_v59 = vpop.permute.xlu0 %593 }
  0x9a   : > { %v586_v60 = vpop.permute.xlu1 %585  ;;  %470 = vrot.lane.b32.xlu2 %v438_v55, %s945_s5  ;;  %v610_v61 = vmul.f32 0.0, %v1068_v59 }
  0x9b   : > { %v600_v62 = vmul.f32 0.0, %v586_v60  ;;  %v597_v5 = vmul.f32 %v586_v60, %v292_v52  ;;  %v596_v23 = vmul.f32 %v586_v60, %v274_v50 }
  0x9c   : > { %654 = vrot.lane.b32.xlu1 %v610_v61, %s945_s5 }
  0x9d   : > { %634 = vrot.lane.b32.xlu0 %v600_v62, %s945_s5 }
  0x9e   : > { %v310_v63 = vpop.f32.mrf.mxu2  ;;  %v328_v1 = vpop.f32.mrf.mxu3 }
  0x9f   : > { %v276_v4 = vpop.f32.mrf.mxu0  ;;  %v1075_v6 = vmul.f32 %v1055_v53, %v310_v63  ;;  %v1078_v7 = vmul.f32 %v1040_v41, %v310_v63  ;;  %v1080_v8 = vmul.f32 %v535_v48, %v328_v1  ;;  %v1085_v10 = vpop.f32.mrf.mxu1  ;;  %v1088_v11 = vmul.f32 %v1055_v53, %v328_v1 }
  0xa0   : > { %v1083_v9 = vmul.f32 %v1051_v49, %v276_v4  ;;  %v1090_v12 = vmul.f32 %v535_v48, %v310_v63  ;;  %v1093_v13 = vmul.f32 %v1048_v45, %v276_v4  ;;  %v439_v15 = vmul.f32 %v426_v46, %v310_v63 }
  0xa1   : > { %v599_v19 = vmul.f32 %v586_v60, %v328_v1  ;;  %v442_v24 = vmul.f32 %v1030_v36, %v276_v4  ;;  %v602_v27 = vmul.f32 %v1044_v43, %v1085_v10  ;;  %v440_v30 = vmul.f32 %v426_v46, %v328_v1 }
  0xa2   : > { %628 = vrot.lane.b32.xlu2 %v597_v5, %s945_s5  ;;  %v598_v35 = vmul.f32 %v586_v60, %v310_v63  ;;  %v443_v44 = vmul.f32 %v1030_v36, %v1085_v10  ;;  %v601_v48 = vmul.f32 %v1044_v43, %v276_v4  ;;  %v728_v60 = vld [vmem:[%s1298_s3] sm:$0xff]  ;;  %v730_v63 = vld [vmem:[%s1298_s3 + $0x10] sm:$0xff] }
  0xa4   : > { %468 = vrot.lane.b32.xlu1 %v437_v14, %s945_s5 }
  0xa5   : > { %472 = vrot.lane.b32.xlu0 %v439_v15, %s945_s5 }
  0xa6   : > { %v1098_v16 = vpop.f32.mrf.mxu2  ;;  %v1100_v17 = vpop.f32.mrf.mxu3 }
  0xa7   : > { %v279_v18 = vpop.f32.mrf.mxu0  ;;  %v1105_v21 = vpop.f32.mrf.mxu1  ;;  %v445_v31 = vmul.f32 %v1030_v36, %v1100_v17  ;;  %v444_v34 = vmul.f32 %v1030_v36, %v1098_v16  ;;  %v603_v37 = vmul.f32 %v1044_v43, %v1098_v16  ;;  %v604_v52 = vmul.f32 %v1044_v43, %v1100_v17 }
  0xa8   : > { %v1103_v20 = vmul.f32 %v1038_v40, %v279_v18  ;;  %v1108_v22 = vmul.f32 %v1042_v42, %v279_v18  ;;  %v447_v39 = vmul.f32 %v1034_v38, %v279_v18  ;;  %v448_v46 = vmul.f32 %v1034_v38, %v1105_v21 }
  0xa9   : > { %v606_v50 = vmul.f32 %v1068_v59, %v279_v18  ;;  %v607_v61 = vmul.f32 %v1068_v59, %v1105_v21 }
  0xaa   : > { %632 = vrot.lane.b32.xlu2 %v599_v19, %s945_s5 }
  0xac   : > { %626 = vrot.lane.b32.xlu1 %v596_v23, %s945_s5 }
  0xad   : > { %478 = vrot.lane.b32.xlu0 %v442_v24, %s945_s5 }
  0xae   : > { %v1114_v25 = vpop.f32.mrf.mxu2  ;;  %v1116_v26 = vpop.f32.mrf.mxu3 }
  0xaf   : > { %v281_v28 = vpop.f32.mrf.mxu0  ;;  %v299_v29 = vpop.f32.mrf.mxu1  ;;  %v450_v47 = vmul.f32 %v1034_v38, %v1116_v26  ;;  %v608_v36 = vmul.f32 %v1068_v59, %v1114_v25  ;;  %v609_v55 = vmul.f32 %v1068_v59, %v1116_v26  ;;  %v449_v62 = vmul.f32 %v1034_v38, %v1114_v25 }
  0xb2   : > { %638 = vrot.lane.b32.xlu2 %v602_v27, %s945_s5 }
  0xb4   : > { %474 = vrot.lane.b32.xlu1 %v440_v30, %s945_s5 }
  0xb5   : > { %484 = vrot.lane.b32.xlu0 %v445_v31, %s945_s5 }
  0xb6   : > { %v317_v32 = vpop.f32.mrf.mxu2  ;;  %v335_v33 = vpop.f32.mrf.mxu3 }
  0xba   : > { %482 = vrot.lane.b32.xlu2 %v444_v34, %s945_s5 }
  0xbc   : > { %630 = vrot.lane.b32.xlu1 %v598_v35, %s945_s5 }
  0xbd   : > { %640 = vrot.lane.b32.xlu0 %v603_v37, %s945_s5 }
  0xc2   : > { %488 = vrot.lane.b32.xlu2 %v447_v39, %s945_s5 }
  0xc4   : > { %480 = vrot.lane.b32.xlu1 %v443_v44, %s945_s5 }
  0xc5   : > { %490 = vrot.lane.b32.xlu0 %v448_v46, %s945_s5 }
  0xc6   : > { %v477_v43 = vpop.permute.xlu2 %476 }
  0xca   : > { %494 = vrot.lane.b32.xlu2 %v450_v47, %s945_s5  ;;  %v389_v47 = vmul.f32 0.0, %v1048_v45 }
  0xcc   : > { %636 = vrot.lane.b32.xlu1 %v601_v48, %s945_s5 }
  0xcd   : > { %646 = vrot.lane.b32.xlu0 %v606_v50, %s945_s5 }
  0xd2   : > { %650 = vrot.lane.b32.xlu2 %v608_v36, %s945_s5 }
  0xd4   : > { %642 = vrot.lane.b32.xlu1 %v604_v52, %s945_s5 }
  0xd5   : > { %652 = vrot.lane.b32.xlu0 %v609_v55, %s945_s5 }
  0xda   : > { %733 = vperm.xlu2 %929, %v728_v60   ;;  %v392_v60 = vmul.f32 %v1048_v45, %v1098_v16 }
  0xdc   : > { %648 = vrot.lane.b32.xlu1 %v607_v61, %s945_s5 }
  0xdd   : > { %697 = vperm.xlu0 %927, %v998_v3   ;;  %v729_v3 = vld [vmem:[%s1298_s3 + $0x8] sm:$0xff] }
  0xe0   : > { %v1170_v1 = vpop.permute.xlu2 %644 }
  0xe2   : > { %743 = vperm.xlu2 %929, %v730_v63  }
  0xe4   : > { %492 = vrot.lane.b32.xlu1 %v449_v62, %s945_s5 }
  0xe5   : > { %931 = vset.pattern.permute.xlu0 %v940_v2 }
  0xe6   : > { %v487_v14 = vpop.permute.xlu1 %486 }
  0xec   : > { %701 = vperm.xlu1 %928, %v982_v0   ;;  %v385_v0 = vmul.f32 0.0, %v1040_v41  ;;  %v393_v41 = vmul.f32 0.0, %v1042_v42 }
  0xf4   : > { %930 = vset.pattern.permute.xlu1 %v940_v2  ;;  %v471_v38 = vpop.permute.xlu2 %470 }
  0xf5   : > { %738 = vperm.xlu1 %930, %v729_v3  }
  0xfc   : > { %v629_v59 = vpop.permute.xlu2 %628 }
  0xfd   : > { %v467_v5 = vpop.permute.xlu0 %466 }
 0x104   : > { %v633_v4 = vpop.permute.xlu2 %632 }
 0x10c   : > { %v1177_v15 = vpop.permute.xlu2 %638 }
 0x10e   : > { %v1179_v18 = vpop.permute.xlu1 %654 }
 0x10f   : > { %v635_v19 = vpop.permute.xlu0 %634 }
 0x114   : > { %v1181_v23 = vpop.permute.xlu2 %482 }
 0x116   : > { %v469_v24 = vpop.permute.xlu1 %468 }
 0x117   : > { %v473_v27 = vpop.permute.xlu0 %472  ;;  %v497_v2 = vsel %vm496_vm1, %v467_v5, %v469_v24  ;;  %v498_v28 = vsel %vm496_vm1, %v469_v24, %v471_v38  ;;  %v707_v5 = vmul.f32 0.0, %v1055_v53 }
 0x118   : > { %v499_v29 = vsel %vm496_vm1, %v471_v38, %v473_v27  ;;  %v521_v30 = vadd.f32 %v497_v2, %v385_v0  ;;  %v522_v31 = vadd.f32 %v498_v28, %v1058_v54  ;;  %v659_v38 = vsel %vm496_vm1, %v633_v4, %v635_v19 }
 0x119   : > { %v523_v32 = vadd.f32 %v499_v29, %v1064_v57 }
 0x11a   : > { %v557_v33 = vadd.f32 %v1053_v51, %v521_v30  ;;  %v558_v34 = vadd.f32 %v1066_v58, %v522_v31 }
 0x11b   : > { %v559_v35 = vadd.f32 %v1090_v12, %v523_v32 }
 0x11c   : > { %v489_v37 = vpop.permute.xlu2 %488 }
 0x11d   : > { %v505_v39 = vsel %vm496_vm1, %v487_v14, %v489_v37 }
 0x11e   : > { %v529_v44 = vadd.f32 %v505_v39, %v393_v41  ;;  %v627_v46 = vpop.permute.xlu1 %626 }
 0x11f   : > { %v479_v48 = vpop.permute.xlu0 %478  ;;  %v656_v54 = vsel %vm496_vm1, %v627_v46, %v629_v59 }
 0x120   : > { %v501_v57 = vsel %vm496_vm1, %v477_v43, %v479_v48  ;;  %v680_v50 = vadd.f32 %v656_v54, %v557_v33  ;;  %v1198_v58 = vadd.f32 %v1103_v20, %v529_v44  ;;  %v552_v20 = vmul.f32 %v1051_v49, %v1100_v17 }
 0x121   : > { %v525_v51 = vadd.f32 %v501_v57, %v389_v47  ;;  %v551_v44 = vmul.f32 %v1051_v49, %v1098_v16 }
 0x122   : > { %v716_v12 = vadd.f32 %v1061_v56, %v680_v50 }
 0x123   : > { %v561_v36 = vadd.f32 %v1083_v9, %v525_v51 }
 0x124   : > { %v1202_v52 = vpop.permute.xlu2 %494 }
 0x126   : > { %v475_v55 = vpop.permute.xlu1 %474 }
 0x127   : > { %v485_v61 = vpop.permute.xlu0 %484  ;;  %v500_v62 = vsel %vm496_vm1, %v473_v27, %v475_v55 }
 0x128   : > { %v504_v43 = vsel %vm496_vm1, %v1181_v23, %v485_v61  ;;  %v524_v63 = vadd.f32 %v500_v62, %v1078_v7 }
 0x129   : > { %v528_v56 = vadd.f32 %v504_v43, %v392_v60 }
 0x12a   : > { %v560_v9 = vadd.f32 %v1080_v8, %v524_v63  ;;  %v396_v63 = vmul.f32 %v1042_v42, %v1114_v25 }
 0x12b   : > { %v1213_v3 = vadd.f32 %v552_v20, %v528_v56 }
 0x12c   : > { %v683_v14 = vadd.f32 %v659_v38, %v560_v9  ;;  %v1217_v0 = vpop.permute.xlu2 %650  ;;  %v395_v9 = vmul.f32 %v1042_v42, %v1105_v21 }
 0x12e   : > { %v631_v24 = vpop.permute.xlu1 %630  ;;  %v719_v2 = vadd.f32 %v707_v5, %v683_v14 }
 0x12f   : > { %v1219_v27 = vpop.permute.xlu0 %640  ;;  %v657_v28 = vsel %vm496_vm1, %v629_v59, %v631_v24  ;;  %v658_v7 = vsel %vm496_vm1, %v631_v24, %v633_v4  ;;  %v550_v59 = vmul.f32 %v1051_v49, %v1085_v10 }
 0x130   : > { %v681_v29 = vadd.f32 %v657_v28, %v558_v34  ;;  %v682_v30 = vadd.f32 %v658_v7, %v559_v35 }
 0x132   : > { %v717_v8 = vadd.f32 %v1075_v6, %v681_v29  ;;  %v718_v31 = vadd.f32 %v1088_v11, %v682_v30  ;;  %v391_v6 = vmul.f32 %v1048_v45, %v1085_v10 }
 0x134   : > { %v734_v19 = vpop.permute.xlu2 %733 }
 0x135   : > { %v746_v53 = vadd.f32 %v734_v19, %v716_v12  ;;  %v747_v32 = vadd.f32 %v734_v19, %v717_v8  ;;  %v748_v33 = vadd.f32 %v734_v19, %v718_v31  ;;  %v749_v41 = vadd.f32 %v734_v19, %v719_v2 }
 0x136   : > { %v481_v4 = vpop.permute.xlu1 %480  ;;  %v554_v12 = vmul.f32 %v1038_v40, %v1105_v21 }
 0x137   : > { %v491_v11 = vpop.permute.xlu0 %490  ;;  %v758_v34 = vmax.f32 %v746_v53, 0.0  ;;  %v759_v35 = vmax.f32 %v747_v32, 0.0  ;;  %v760_v39 = vmax.f32 %v748_v33, 0.0  ;;  %v761_v46 = vmax.f32 %v749_v41, 0.0 }
 0x138   : > { %v502_v47 = vsel %vm496_vm1, %v479_v48, %v481_v4  ;;  %v503_v54 = vsel %vm496_vm1, %v481_v4, %v1181_v23  ;;  %v506_v57 = vsel %vm496_vm1, %v489_v37, %v491_v11  ;;  %v661_v23 = vsel %vm496_vm1, %v1177_v15, %v1219_v27 }
 0x139   : > { %770 = vst [vmem:[%s1229_s17] sm:$0xff] %v758_v34  ;;  %v526_v45 = vadd.f32 %v502_v47, %v1093_v13  ;;  %v527_v50 = vadd.f32 %v503_v54, %v391_v6  ;;  %v530_v51 = vadd.f32 %v506_v57, %v1108_v22 }
 0x13a   : > { %771 = vst [vmem:[%s1229_s17 + $0x8] sm:$0xff] %v759_v35 }
 0x13b   : > { %772 = vst [vmem:[%s1229_s17 + $0x10] sm:$0xff] %v760_v39  ;;  %v562_v49 = vadd.f32 %v550_v59, %v526_v45  ;;  %v563_v55 = vadd.f32 %v551_v44, %v527_v50  ;;  %v566_v60 = vadd.f32 %v554_v12, %v530_v51 }
 0x13c   : > { %773 = vst [vmem:[%s1229_s17 + $0x18] sm:$0xff] %v761_v46 }
 0x13d   : > { %v685_v37 = vadd.f32 %v661_v23, %v562_v49 }
 0x13e   : > { %v637_v48 = vpop.permute.xlu1 %636 }
 0x13f   : > { %v660_v13 = vsel %vm496_vm1, %v637_v48, %v1177_v15  ;;  %v647_v62 = vpop.permute.xlu0 %646  ;;  %v556_v15 = vmul.f32 %v1038_v40, %v1116_v26 }
 0x140   : > { %v684_v61 = vadd.f32 %v660_v13, %v561_v36  ;;  %v555_v36 = vmul.f32 %v1038_v40, %v1114_v25 }
 0x146   : > { %v643_v22 = vpop.permute.xlu1 %642 }
 0x147   : > { %v653_v20 = vpop.permute.xlu0 %652  ;;  %v662_v59 = vsel %vm496_vm1, %v1219_v27, %v643_v22  ;;  %v663_v4 = vsel %vm496_vm1, %v643_v22, %v1170_v1 }
 0x148   : > { %v667_v7 = vsel %vm496_vm1, %v653_v20, %v1179_v18  ;;  %v686_v47 = vadd.f32 %v662_v59, %v563_v55  ;;  %v687_v1 = vadd.f32 %v663_v4, %v1213_v3 }
 0x14e   : > { %v649_v43 = vpop.permute.xlu1 %648 }
 0x14f   : > { %v664_v42 = vsel %vm496_vm1, %v647_v62, %v649_v43  ;;  %v665_v29 = vsel %vm496_vm1, %v649_v43, %v1217_v0  ;;  %v698_v8 = vpop.permute.xlu0 %697 }
 0x150   : > { %v688_v31 = vadd.f32 %v664_v42, %v1198_v58  ;;  %v689_v40 = vadd.f32 %v665_v29, %v566_v60  ;;  %v709_v35 = vmul.f32 %v698_v8, %v1098_v16 }
 0x152   : > { %v721_v50 = vadd.f32 %v709_v35, %v685_v37 }
 0x156   : > { %v493_v56 = vpop.permute.xlu1 %492 }
 0x157   : > { %v507_v38 = vsel %vm496_vm1, %v491_v11, %v493_v56  ;;  %v508_v5 = vsel %vm496_vm1, %v493_v56, %v1202_v52  ;;  %v666_v52 = vsel %vm496_vm1, %v1217_v0, %v653_v20  ;;  %v708_v0 = vmul.f32 %v698_v8, %v1085_v10 }
 0x158   : > { %v531_v14 = vadd.f32 %v507_v38, %v395_v9  ;;  %v532_v24 = vadd.f32 %v508_v5, %v396_v63 }
 0x159   : > { %v720_v45 = vadd.f32 %v708_v0, %v684_v61 }
 0x15a   : > { %v567_v2 = vadd.f32 %v555_v36, %v531_v14  ;;  %v568_v28 = vadd.f32 %v556_v15, %v532_v24 }
 0x15c   : > { %v691_v30 = vadd.f32 %v667_v7, %v568_v28  ;;  %v690_v19 = vadd.f32 %v666_v52, %v567_v2 }
 0x15e   : > { %v702_v53 = vpop.permute.xlu1 %701 }
 0x15f   : > { %v712_v32 = vmul.f32 %v702_v53, %v1105_v21  ;;  %v713_v33 = vmul.f32 %v702_v53, %v1114_v25  ;;  %v714_v18 = vmul.f32 %v702_v53, %v1116_v26  ;;  %v715_v41 = vmul.f32 0.0, %v702_v53  ;;  %v744_v26 = vpop.permute.xlu2 %743 }
 0x160   : > { %v710_v21 = vmul.f32 %v698_v8, %v1100_v17  ;;  %v711_v25 = vmul.f32 0.0, %v698_v8 }
 0x161   : > { %v724_v6 = vadd.f32 %v712_v32, %v688_v31  ;;  %v725_v58 = vadd.f32 %v713_v33, %v689_v40  ;;  %v726_v11 = vadd.f32 %v714_v18, %v690_v19  ;;  %v727_v34 = vadd.f32 %v715_v41, %v691_v30 }
 0x162   : > { %v722_v17 = vadd.f32 %v710_v21, %v686_v47  ;;  %v723_v51 = vadd.f32 %v711_v25, %v687_v1 }
 0x163   : > { %v754_v39 = vadd.f32 %v744_v26, %v724_v6  ;;  %v755_v44 = vadd.f32 %v744_v26, %v725_v58  ;;  %v756_v27 = vadd.f32 %v744_v26, %v726_v11  ;;  %v757_v46 = vadd.f32 %v744_v26, %v727_v34 }
 0x165   : > { %v766_v10 = vmax.f32 %v754_v39, 0.0  ;;  %v767_v54 = vmax.f32 %v755_v44, 0.0  ;;  %v768_v57 = vmax.f32 %v756_v27, 0.0  ;;  %v769_v16 = vmax.f32 %v757_v46, 0.0 }
 0x167   : > { %778 = vst [vmem:[%s1229_s17 + $0x40] sm:$0xff] %v766_v10  ;;  %v739_v12 = vpop.permute.xlu1 %738 }
 0x168   : > { %779 = vst [vmem:[%s1229_s17 + $0x48] sm:$0xff] %v767_v54  ;;  %v750_v49 = vadd.f32 %v739_v12, %v720_v45  ;;  %v751_v55 = vadd.f32 %v739_v12, %v721_v50  ;;  %v752_v3 = vadd.f32 %v739_v12, %v722_v17  ;;  %v753_v60 = vadd.f32 %v739_v12, %v723_v51 }
 0x169   : > { %780 = vst [vmem:[%s1229_s17 + $0x50] sm:$0xff] %v768_v57 }
 0x16a   : > { %781 = vst [vmem:[%s1229_s17 + $0x58] sm:$0xff] %v769_v16  ;;  %v762_v23 = vmax.f32 %v750_v49, 0.0  ;;  %v763_v48 = vmax.f32 %v751_v55, 0.0  ;;  %v764_v13 = vmax.f32 %v752_v3, 0.0  ;;  %v765_v61 = vmax.f32 %v753_v60, 0.0 }
 0x16c   : > { %774 = vst [vmem:[%s1229_s17 + $0x20] sm:$0xff] %v762_v23 }
 0x16d   : > { %775 = vst [vmem:[%s1229_s17 + $0x28] sm:$0xff] %v763_v48 }
 0x16e   : > { %776 = vst [vmem:[%s1229_s17 + $0x30] sm:$0xff] %v764_v13 }
 0x16f   : > { %777 = vst [vmem:[%s1229_s17 + $0x38] sm:$0xff] %v765_v61 }
 0x170 PF: > { %s14_s15 = sadd.s32 1, %s938_s15  }
 0x171   : > { %p11_p4 = scmp.ge.s32.totalorder %s14_s15, 4  }
 0x173   :  { %13 = sbr.rel (!%p11_p4) target bundleno = 1 (0x1), region = 66 }

</bundles_post_ra>
